<compile_context>
chip_gen: v5e
topology: v5e:2x2
jax: 0.10.0
libtpu: 0.0.40
codegen_flags: <defaults>
</compile_context>

<pallas_src>
import functools
import math

import jax
import jax.numpy as jnp
from jax.experimental import pallas as pl
from jax.experimental.pallas import tpu as pltpu

_SQRT2 = math.sqrt(2.0)


def _round_up(v, m):
    return ((v + m - 1) // m) * m


def _choose_nk_tiles(N, K, tn, tk):
    tn = min(tn, _round_up(N, 128))
    tk = min(tk, _round_up(K, 128))
    # v7x has 2 TensorCores per chip: make sure a "parallel" grid axis has
    # >= 2 blocks even when the batch fits in a single M tile, so the kernel
    # is not pinned to one core.  Neutral on single-TC v5e/v6e.
    if _round_up(N, tn) // tn < 2 and N > 128:
        tn = _round_up(-(-N // 2), 128)  # ceil(N/2) rounded up to a lane tile
    return tn, tk


def prepare_equal_linear_params(weight, bias, *, lr_mul=1.0, activation=None,
                                tn=512, tk=2048, param_dtype=jnp.bfloat16):
    """One-time parameter preparation (call OUTSIDE the hot path).

    * transposes the (out_dim, in_dim) weight to (in_dim, out_dim) so the
      kernel runs a native NN contraction on the MXU (no hidden transpose),
    * zero-pads weight/bias to tile multiples ONCE instead of per forward,
    * casts the weight to bf16 (MXU-native, halves weight HBM traffic),
    * folds lr_mul (and the sqrt(2) of fused_leaky_relu) into the bias and
      into the scalar epilogue scale.
    """
    N, K = weight.shape
    tn, tk = _choose_nk_tiles(N, K, tn, tk)
    Np, Kp = _round_up(N, tn), _round_up(K, tk)

    gain = _SQRT2 if activation else 1.0
    scale = (1.0 / math.sqrt(K)) * lr_mul * gain  # applied to the f32 accumulator

    w_t = jnp.transpose(weight)                                    # (K, N)
    if (Kp, Np) != (K, N):
        w_t = jnp.pad(w_t, ((0, Kp - K), (0, Np - N)))
    w_t = w_t.astype(param_dtype)

    if bias is None:
        b = jnp.zeros((N,), jnp.float32)
    else:
        b = bias.astype(jnp.float32)
    b = b * (lr_mul * gain)
    if Np != N:
        b = jnp.pad(b, (0, Np - N))
    b2d = b.reshape(1, Np)

    return dict(weight_t=w_t, bias=b2d, scale=scale, activation=activation,
                tn=tn, tk=tk, out_dim=N, in_dim=K)


def _equal_linear_kernel(x_ref, w_ref, b_ref, o_ref, *, scale, activation):
    k = pl.program_id(2)

    @pl.when(k == 0)
    def _():
        o_ref[...] = jnp.zeros_like(o_ref)

    # bf16 x bf16 -> f32 on the MXU; accumulate directly into the resident
    # f32 output block (its index map is k-invariant), no scratch buffer.
    o_ref[...] += jnp.dot(x_ref[...].astype(w_ref.dtype), w_ref[...],
                          preferred_element_type=jnp.float32)

    @pl.when(k == pl.num_programs(2) - 1)
    def _():
        # Epilogue: equalized-lr scale + (pre-scaled) bias; sqrt(2) of
        # fused_leaky_relu already folded into scale/bias, so the activation
        # is a single max.
        out = o_ref[...] * scale + b_ref[...]
        if activation:
            out = jnp.maximum(out, 0.2 * out)
        o_ref[...] = out


def equal_linear(x, params, *, tm=256):
    """Hot-path forward: x (B, in_dim) f32  ->  (B, out_dim) f32."""
    B, K = x.shape
    assert K == params["in_dim"]
    w_t = params["weight_t"]        # (Kp, Np) bf16 (or f32)
    b2d = params["bias"]            # (1, Np)  f32
    tn, tk = params["tn"], params["tk"]
    Kp, Np = w_t.shape
    N = params["out_dim"]

    tm = min(tm, _round_up(B, 8))
    Mp = _round_up(B, tm)

    x_p = x
    if (Mp, Kp) != (B, K):
        # Only the small activation tensor is padded per call; the weight was
        # padded once in prepare_equal_linear_params.
        x_p = jnp.pad(x, ((0, Mp - B), (0, Kp - K)))

    grid = (Mp // tm, Np // tn, Kp // tk)
    kernel = functools.partial(_equal_linear_kernel,
                               scale=params["scale"],
                               activation=params["activation"])

    out = pl.pallas_call(
        kernel,
        out_shape=jax.ShapeDtypeStruct((Mp, Np), jnp.float32),
        grid_spec=pltpu.PrefetchScalarGridSpec(
            num_scalar_prefetch=0,
            grid=grid,
            in_specs=[
                pl.BlockSpec((tm, tk), lambda i, j, k: (i, k)),   # x
                pl.BlockSpec((tk, tn), lambda i, j, k: (k, j)),   # weight (K, N)
                pl.BlockSpec((1, tn), lambda i, j, k: (0, j)),    # bias
            ],
            out_specs=pl.BlockSpec((tm, tn), lambda i, j, k: (i, j)),
        ),
        compiler_params=pltpu.CompilerParams(
            dimension_semantics=("parallel", "parallel", "arbitrary"),
            vmem_limit_bytes=32 * 1024 * 1024,
        ),
        cost_estimate=pl.CostEstimate(
            flops=2 * Mp * Np * Kp,
            transcendentals=0,
            # Account for tiling reuse: x is re-read per N block, weight per
            # M block.
            bytes_accessed=(x_p.dtype.itemsize * Mp * Kp * (Np // tn)
                            + w_t.dtype.itemsize * Kp * Np * (Mp // tm)
                            + 4 * Mp * Np),
        ),
    )(x_p, w_t, b2d)

    if (Mp, Np) != (B, N):
        out = out[:B, :N]
    return out


def equal_linear_apply(x, weight, bias, *, lr_mul=1.0, activation=None,
                       param_dtype=jnp.bfloat16, tm=256, tn=512, tk=2048):
    """Convenience one-shot wrapper (prep + forward)."""
    params = prepare_equal_linear_params(
        weight, bias, lr_mul=lr_mul, activation=activation,
        tn=tn, tk=tk, param_dtype=param_dtype)
    return equal_linear(x, params, tm=tm)


def equal_linear_reference(x, weight, bias, *, lr_mul=1.0, activation=None):
    scale = 1.0 / math.sqrt(x.shape[-1]) * lr_mul
    out = x @ (weight * scale).T + bias * lr_mul
    if activation:
        out = jnp.where(out >= 0.0, out, 0.2 * out) * _SQRT2
    return out


if __name__ == "__main__":
    key = jax.random.PRNGKey(0)
    k1, k2, k3, k4, k5, k6 = jax.random.split(key, 6)

    # ---- Case 1: small shapes, no activation, bf16 + f32 param paths. -----
    batch, in_dim, out_dim = 8, 32, 32
    lr_mul = 1.0
    weight = jax.random.normal(k1, (out_dim, in_dim), jnp.float32) / lr_mul
    bias = jnp.zeros((out_dim,), jnp.float32)
    x = jax.random.normal(k2, (batch, in_dim), jnp.float32)

    ref = equal_linear_reference(x, weight, bias, lr_mul=lr_mul)

    out_f32 = jax.block_until_ready(
        equal_linear_apply(x, weight, bias, lr_mul=lr_mul,
                           param_dtype=jnp.float32))
    assert jnp.allclose(out_f32, ref, atol=1e-4, rtol=1e-4)

    out_bf16 = jax.block_until_ready(
        equal_linear_apply(x, weight, bias, lr_mul=lr_mul))
    assert jnp.allclose(out_bf16, ref, atol=5e-2, rtol=5e-2)

    # ---- Case 2: unaligned shapes, fused leaky-relu, lr_mul=0.01. ---------
    batch2, in2, out2 = 5, 40, 24
    lr_mul2 = 0.01
    weight2 = jax.random.normal(k3, (out2, in2), jnp.float32) / lr_mul2
    bias2 = jnp.full((out2,), 0.1, jnp.float32)
    x2 = jax.random.normal(k4, (batch2, in2), jnp.float32)

    ref2 = equal_linear_reference(x2, weight2, bias2, lr_mul=lr_mul2,
                                  activation="fused_lrelu")
    out2_f32 = jax.block_until_ready(
        equal_linear_apply(x2, weight2, bias2, lr_mul=lr_mul2,
                           activation="fused_lrelu", param_dtype=jnp.float32))
    assert jnp.allclose(out2_f32, ref2, atol=1e-4, rtol=1e-4)

    out2_bf16 = jax.block_until_ready(
        equal_linear_apply(x2, weight2, bias2, lr_mul=lr_mul2,
                           activation="fused_lrelu"))
    assert jnp.allclose(out2_bf16, ref2, atol=5e-2, rtol=5e-2)

    # ---- Case 3: multi-block N grid (exercises the v7x N-split path). -----
    batch3, in3, out3 = 16, 256, 384
    weight3 = jax.random.normal(k5, (out3, in3), jnp.float32)
    bias3 = jnp.full((out3,), 0.05, jnp.float32)
    x3 = jax.random.normal(k6, (batch3, in3), jnp.float32)

    params3 = prepare_equal_linear_params(weight3, bias3, lr_mul=1.0,
                                          activation="fused_lrelu")
    ref3 = equal_linear_reference(x3, weight3, bias3, lr_mul=1.0,
                                  activation="fused_lrelu")
    out3 = jax.block_until_ready(equal_linear(x3, params3))
    assert out3.shape == (batch3, out3_dim := out3.shape[1]) and out3_dim == 384
    assert jnp.allclose(out3, ref3, atol=5e-2, rtol=5e-2)

    print("KERNEL_OK")
</pallas_src>

<mosaic_0001>
module attributes {stable_mosaic.version = 11 : i64} {
  func.func @_equal_linear_kernel(%arg0: i32, %arg1: i32, %arg2: i32, %arg3: memref<8x128xf32, #tpu.memory_space<vmem>>, %arg4: memref<128x128xf32, #tpu.memory_space<vmem>>, %arg5: memref<1x128xf32, #tpu.memory_space<vmem>>, %arg6: memref<8x128xf32, #tpu.memory_space<vmem>>) attributes {dimension_semantics = [#tpu.dimension_semantics<parallel>, #tpu.dimension_semantics<parallel>, #tpu.dimension_semantics<arbitrary>], iteration_bounds = array<i64: 1, 1, 1>, scalar_prefetch = 0 : i64, scratch_operands = 0 : i64, tpu.core_type = #tpu.core_type<tc>, window_params = [{transform_indices = @transform_0, window_bounds = array<i64: 8, 128>}, {transform_indices = @transform_1, window_bounds = array<i64: 128, 128>}, {transform_indices = @transform_2, window_bounds = array<i64: 1, 128>}, {transform_indices = @transform_3, window_bounds = array<i64: 8, 128>}]} {
    %c0_i32 = arith.constant 0 : i32
    %0 = arith.cmpi eq, %arg2, %c0_i32 : i32
    %1 = arith.extui %0 : i1 to i32
    %c0_i32_0 = arith.constant 0 : i32
    %2 = arith.cmpi ne, %1, %c0_i32_0 : i32
    scf.if %2 {
      %cst_10 = arith.constant 0.000000e+00 : f32
      %12 = vector.broadcast %cst_10 : f32 to vector<8x128xf32>
      %c0_11 = arith.constant 0 : index
      %c0_12 = arith.constant 0 : index
      %13 = vector.load %arg6[%c0_11, %c0_12] : memref<8x128xf32, #tpu.memory_space<vmem>>, vector<8x128xf32>
      tpu.vector_store %arg6[%c0_11, %c0_12], %12 {strides = array<i32>} : memref<8x128xf32, #tpu.memory_space<vmem>>, vector<8x128xf32>,
    } else {
    }
    %c0 = arith.constant 0 : index
    %c0_1 = arith.constant 0 : index
    %3 = vector.load %arg6[%c0, %c0_1] : memref<8x128xf32, #tpu.memory_space<vmem>>, vector<8x128xf32>
    %c0_2 = arith.constant 0 : index
    %c0_3 = arith.constant 0 : index
    %4 = vector.load %arg3[%c0_2, %c0_3] : memref<8x128xf32, #tpu.memory_space<vmem>>, vector<8x128xf32>
    %c0_4 = arith.constant 0 : index
    %c0_5 = arith.constant 0 : index
    %5 = vector.load %arg4[%c0_4, %c0_5] : memref<128x128xf32, #tpu.memory_space<vmem>>, vector<128x128xf32>
    %cst = arith.constant dense<0.000000e+00> : vector<8x128xf32>
    %6 = tpu.matmul %4, %5, %cst {dimension_numbers = #tpu.dot_dimension_numbers<[1], [0], [0], [1], [0, 0, 1, 1], [], []>} : vector<8x128xf32>, vector<128x128xf32>, vector<8x128xf32> -> vector<8x128xf32>
    %7 = arith.addf %3, %6 : vector<8x128xf32>
    %c0_6 = arith.constant 0 : index
    %c0_7 = arith.constant 0 : index
    %8 = vector.load %arg6[%c0_6, %c0_7] : memref<8x128xf32, #tpu.memory_space<vmem>>, vector<8x128xf32>
    tpu.vector_store %arg6[%c0_6, %c0_7], %7 {strides = array<i32>} : memref<8x128xf32, #tpu.memory_space<vmem>>, vector<8x128xf32>,
    %c0_i32_8 = arith.constant 0 : i32
    %9 = arith.cmpi eq, %arg2, %c0_i32_8 : i32
    %10 = arith.extui %9 : i1 to i32
    %c0_i32_9 = arith.constant 0 : i32
    %11 = arith.cmpi ne, %10, %c0_i32_9 : i32
    scf.if %11 {
      %c0_10 = arith.constant 0 : index
      %c0_11 = arith.constant 0 : index
      %12 = vector.load %arg6[%c0_10, %c0_11] : memref<8x128xf32, #tpu.memory_space<vmem>>, vector<8x128xf32>
      %cst_12 = arith.constant 0.176776692 : f32
      %13 = vector.broadcast %cst_12 : f32 to vector<8x128xf32>
      %14 = arith.mulf %12, %13 : vector<8x128xf32>
      %c0_13 = arith.constant 0 : index
      %c0_14 = arith.constant 0 : index
      %15 = vector.load %arg5[%c0_13, %c0_14] : memref<1x128xf32, #tpu.memory_space<vmem>>, vector<1x128xf32>
      %16 = vector.broadcast %15 : vector<1x128xf32> to vector<8x128xf32>
      %17 = arith.addf %14, %16 : vector<8x128xf32>
      %c0_15 = arith.constant 0 : index
      %c0_16 = arith.constant 0 : index
      %18 = vector.load %arg6[%c0_15, %c0_16] : memref<8x128xf32, #tpu.memory_space<vmem>>, vector<8x128xf32>
      tpu.vector_store %arg6[%c0_15, %c0_16], %17 {strides = array<i32>} : memref<8x128xf32, #tpu.memory_space<vmem>>, vector<8x128xf32>,
    } else {
    }
    return
  }
  func.func @transform_0(%arg0: i32, %arg1: i32, %arg2: i32) -> (i32, i32) {
    %c0_i32 = arith.constant 0 : i32
    return %arg0, %arg2 : i32, i32
  }
  func.func @transform_1(%arg0: i32, %arg1: i32, %arg2: i32) -> (i32, i32) {
    %c0_i32 = arith.constant 0 : i32
    return %arg2, %arg1 : i32, i32
  }
  func.func @transform_2(%arg0: i32, %arg1: i32, %arg2: i32) -> (i32, i32) {
    %c0_i32 = arith.constant 0 : i32
    %c0_i32_0 = arith.constant 0 : i32
    return %c0_i32, %arg1 : i32, i32
  }
  func.func @transform_3(%arg0: i32, %arg1: i32, %arg2: i32) -> (i32, i32) {
    %c0_i32 = arith.constant 0 : i32
    return %arg0, %arg1 : i32, i32
  }
}

</mosaic_0001>

<bundles_post_ra>
// kernel: tpu_custom_call.1
= control target key start
LH: loop header
LB: loop body
LE: loop exit
PB: predicated region body
PF: predicated region fallthrough
CT: control target
= control target key end

     0   :  { %8 = vsyncpa [#allocation3], 0  ;;  %s241_s0 = inlined_call_operand.hbm [shape: f32[8,128], index: 0, kind: input, shape index: {}]   ;;  %s242_s1 = inlined_call_operand.hbm [shape: f32[128,128], index: 1, kind: input, shape index: {}]   ;;  %s243_s2 = inlined_call_operand.vmem [shape: f32[1,128], index: 2, kind: input, shape index: {}]   ;;  %s244_s3 = inlined_call_operand.hbm [shape: f32[8,128], index: 3, kind: output, shape index: {}]  }
   0x1   :  { %9 = vsyncpa [#allocation6], 0 }
   0x2   :  { %10 = vsyncpa [#allocation4], 0  ;;  %s16_s14 = sshll.u32 %s241_s0, 4  ;;  %s204_s15 = smov [#allocation2]   ;;  %s17_s14 = int_to_ptr.hbm [resolvable:$true] %s16_s14 }
   0x3   :  { %s18_s16 = sshll.u32 %s204_s15, 4  ;;  %s26_s19 = sshll.u32 %s242_s1, 4  ;;  %s19_s16 = int_to_ptr.vmem [resolvable:$true] %s18_s16  ;;  %s27_s19 = int_to_ptr.hbm [resolvable:$true] %s26_s19 }
   0x4   :  { %21 = dma.hbm_to_vmem [thread:$0]  %s17_s14, 128, %s19_s16, [#allocation3]  }
   0x5   :  { %s205_s20 = smov [#allocation5]   ;;  %s206_s22 = smov 128  }
   0x6   :  { %s28_s21 = sshll.u32 %s205_s20, 4  ;;  %s207_s23 = smov 8   ;;  %s29_s21 = int_to_ptr.vmem [resolvable:$true] %s28_s21 }
   0x7   :  { %34 = dma.hbm_to_vmem [thread:$0]  %s27_s19, 2048, %s29_s21, [#allocation6], %s206_s22, %s206_s22, %s207_s23  }
   0x8   :  { %198 = dma.done.wait [#allocation3], 128  }
   0x9   :  { %199 = vsyncadd [#allocation3], 4294967168 }
   0xa   :  { %200 = dma.done.wait [#allocation6], 2048  }
   0xb   :  { %201 = vsyncadd [#allocation6], 4294965248  ;;  %v67_v0 = vld [vmem:[#allocation5 + $0x78] sm:$0xff]  ;;  %v66_v1 = vld [vmem:[#allocation5 + $0x70] sm:$0xff]  ;;  %s208_s24 = smov [#allocation7]   ;;  %s108_s28 = sshll.u32 %s244_s3, 4  ;;  %s109_s28 = int_to_ptr.hbm [resolvable:$true] %s108_s28 }
   0xc   :  { %68 = vmatpush.msra.mxu0 %v67_v0  ;;  %v65_v2 = vld [vmem:[#allocation5 + $0x68] sm:$0xff]  ;;  %v64_v3 = vld [vmem:[#allocation5 + $0x60] sm:$0xff]  ;;  %v63_v4 = vld [vmem:[#allocation5 + $0x58] sm:$0xff]  ;;  %s106_s25 = sshll.u32 %s208_s24, 4  ;;  %s107_s25 = int_to_ptr.vmem [resolvable:$true] %s106_s25 }
   0xd   :  { %v62_v5 = vld [vmem:[#allocation5 + $0x50] sm:$0xff]  ;;  %v61_v6 = vld [vmem:[#allocation5 + $0x48] sm:$0xff]  ;;  %v60_v7 = vld [vmem:[#allocation5 + $0x40] sm:$0xff] }
   0xe   :  { %69 = vmatpush.msra.mxu0 %v66_v1  ;;  %v59_v8 = vld [vmem:[#allocation5 + $0x38] sm:$0xff]  ;;  %v58_v9 = vld [vmem:[#allocation5 + $0x30] sm:$0xff]  ;;  %v57_v10 = vld [vmem:[#allocation5 + $0x28] sm:$0xff] }
   0xf   :  { %v56_v11 = vld [vmem:[#allocation5 + $0x20] sm:$0xff]  ;;  %v55_v12 = vld [vmem:[#allocation5 + $0x18] sm:$0xff]  ;;  %v54_v13 = vld [vmem:[#allocation5 + $0x10] sm:$0xff] }
  0x10   :  { %70 = vmatpush.msra.mxu0 %v65_v2  ;;  %v53_v14 = vld [vmem:[#allocation5 + $0x8] sm:$0xff]  ;;  %v52_v15 = vld [vmem:[#allocation5] sm:$0xff]  ;;  %v51_v16 = vld [vmem:[#allocation2] sm:$0xff] }
  0x11   :  { %v125_v18 = vld [vmem:[%s243_s2] ss:$0 sm:$0xff] }
  0x12   :  { %71 = vmatpush.msra.mxu0 %v64_v3 }
  0x14   :  { %72 = vmatpush.msra.mxu0 %v63_v4 }
  0x16   :  { %73 = vmatpush.msra.mxu0 %v62_v5 }
  0x18   :  { %74 = vmatpush.msra.mxu0 %v61_v6 }
  0x1a   :  { %75 = vmatpush.msra.mxu0 %v60_v7 }
  0x1c   :  { %76 = vmatpush.msra.mxu0 %v59_v8 }
  0x1e   :  { %77 = vmatpush.msra.mxu0 %v58_v9 }
  0x20   :  { %78 = vmatpush.msra.mxu0 %v57_v10 }
  0x22   :  { %79 = vmatpush.msra.mxu0 %v56_v11 }
  0x24   :  { %80 = vmatpush.msra.mxu0 %v55_v12 }
  0x26   :  { %81 = vmatpush.msra.mxu0 %v54_v13 }
  0x28   :  { %82 = vmatpush.msra.mxu0 %v53_v14 }
  0x2a   :  { %83 = vmatpush.msra.mxu0 %v52_v15 }
  0x2b   :  { %84 = vmatmul.f32.vlgmr.msra.gmra.mxu0 %v51_v16 }
  0xa8   :  { %v85_v17 = vpop.f32.mrf.mxu0 }
  0xa9   :  { %v94_v19 = vmul.f32 0.17677669, %v85_v17 }
  0xab   :  { %v99_v20 = vadd.f32 %v125_v18, %v94_v19 }
  0xad   :  { %100 = vst [vmem:[#allocation7] sm:$0xff] %v99_v20 }
  0xae   :  { %111 = dma.vmem_to_hbm [thread:$0]  %s107_s25, 128, %s109_s28, [#allocation4]  }
  0xaf   :  { %202 = dma.done.wait [#allocation4], 128  }
  0xb0   :  { %203 = vsyncadd [#allocation4], 4294967168 }
  0xb1   :  { %116 = vsyncpa [#allocation3], 1 }
  0xb2   :  { %117 = vsyncpa [#allocation6], 1 }
  0xb3   :  { %118 = vsyncpa [#allocation4], 1 }

</bundles_post_ra>
